<compile_context>
chip_gen: v7x
topology: tpu7x:2x2x1
jax: 0.10.0
libtpu: 0.0.40
codegen_flags: <defaults>
</compile_context>

<pallas_src>
import jax
import jax.numpy as jnp
from jax.experimental import pallas as pl
from jax.experimental.pallas import tpu as pltpu

IN_DIM = 4      # observation dim
HIDDEN = 128    # fc1 width
N_PI = 2        # actions
SLAB_ROWS = 8 + HIDDEN   # small params padded to one (8,128) tile + head weight


# ----------------------------------------------------------------------------
# Pallas kernel: full forward pass in VMEM.  Shapes are tiny (B<=8, hidden=128)
# so a single grid-less invocation with full-array blocks is used.
# ----------------------------------------------------------------------------
def actor_critic_kernel(x_ref, p_ref, out_ref):
    x = x_ref[...]                                    # [B, 4]

    # Static slices of the packed parameter slab (zero-cost ref views).
    w1 = p_ref[0:IN_DIM, :]                           # [4, 128]
    b1 = p_ref[IN_DIM:IN_DIM + 1, :]                  # [1, 128]
    b_head = p_ref[IN_DIM + 1:IN_DIM + 2, :]          # [1, 128] (pi bias 0:2, v bias 2)
    w_head = p_ref[8:8 + HIDDEN, :]                   # [128, 128] fused/padded heads

    # fc1 + relu -> hidden [B, 128]
    h = jnp.dot(x, w1, preferred_element_type=jnp.float32) + b1
    h = jnp.maximum(h, 0.0)

    # fused heads: [B, 128]; lanes 0:2 = pi logits, lane 2 = v, lanes 3:128 = 0
    head = jnp.dot(h, w_head, preferred_element_type=jnp.float32) + b_head

    # per-column softmax over dim=0 (batch axis), matching F.softmax(pol, dim=0).
    # Computed for all 128 lanes (one vreg, vectorized); only lanes 0:2 kept.
    m = jnp.max(head, axis=0, keepdims=True)          # [1, 128]
    e = jnp.exp(head - m)
    soft = e / jnp.sum(e, axis=0, keepdims=True)      # exact divide (numerics)

    # Lane-dense output: softmaxed pi in lanes 0:2, raw head (v / zeros) beyond.
    col = jax.lax.broadcasted_iota(jnp.int32, head.shape, dimension=1)
    out_ref[...] = jnp.where(col < N_PI, soft, head)  # single unmasked store


# ----------------------------------------------------------------------------
# One-time parameter fusion (init-time, NOT in the per-call path).
# ----------------------------------------------------------------------------
def fuse_params(w1, b1, w_pi, b_pi, w_v, b_v):
    slab = jnp.zeros((SLAB_ROWS, HIDDEN), jnp.float32)
    slab = slab.at[0:IN_DIM, :].set(w1)
    slab = slab.at[IN_DIM, :].set(b1.reshape(-1))
    b_head = (jnp.zeros((HIDDEN,), jnp.float32)
              .at[0:N_PI].set(b_pi.reshape(-1))
              .at[N_PI].set(b_v.reshape(-1)[0]))
    slab = slab.at[IN_DIM + 1, :].set(b_head)
    w_head = (jnp.zeros((HIDDEN, HIDDEN), jnp.float32)
              .at[:, 0:N_PI].set(w_pi)
              .at[:, N_PI:N_PI + 1].set(w_v))
    slab = slab.at[8:8 + HIDDEN, :].set(w_head)
    return slab


@jax.jit
def actor_critic_forward(x, param_slab):
    B = x.shape[0]
    vmem = pl.BlockSpec(memory_space=pltpu.MemorySpace.VMEM)
    out = pl.pallas_call(
        actor_critic_kernel,
        out_shape=jax.ShapeDtypeStruct((B, HIDDEN), jnp.float32),
        in_specs=[vmem, vmem],        # 2 input DMAs: x + packed parameter slab
        out_specs=vmem,
        cost_estimate=pl.CostEstimate(
            flops=2 * B * (IN_DIM * HIDDEN + HIDDEN * HIDDEN),
            transcendentals=B * HIDDEN,
            bytes_accessed=4 * (B * IN_DIM + SLAB_ROWS * HIDDEN + B * HIDDEN)),
        # Total resident data ~74 KiB: far under scoped-VMEM defaults on
        # v5e/v6e and v7x; no vmem_limit needed.
    )(x, param_slab)
    pi = out[:, 0:N_PI]                               # [B, 2]
    v = out[:, N_PI:N_PI + 1]                         # [B, 1]
    return pi, v


# ----------------------------------------------------------------------------
# Deterministic parameter init (mimics nn.Linear uniform(-1/sqrt(fan_in), ...))
# Kept in float32 on all generations (v5e VPU/EUP have no bf16; no MXU win
# from bf16 at these shapes) — do not down-cast.
# ----------------------------------------------------------------------------
def init_params(key):
    k1, k2, k3, k4, k5, k6 = jax.random.split(key, 6)

    def lin(kw, kb, fan_in, fan_out):
        bound = 1.0 / jnp.sqrt(fan_in)
        w = jax.random.uniform(kw, (fan_in, fan_out), jnp.float32, -bound, bound)
        b = jax.random.uniform(kb, (1, fan_out), jnp.float32, -bound, bound)
        return w, b

    w1, b1 = lin(k1, k2, IN_DIM, HIDDEN)      # fc1
    w_pi, b_pi = lin(k3, k4, HIDDEN, N_PI)    # fc_pi
    w_v, b_v = lin(k5, k6, HIDDEN, 1)         # fc_v
    return w1, b1, w_pi, b_pi, w_v, b_v


def reference_forward(x, w1, b1, w_pi, b_pi, w_v, b_v):
    h = jnp.maximum(x @ w1 + b1, 0.0)
    pol = h @ w_pi + b_pi
    pi = jax.nn.softmax(pol, axis=0)   # dim=0, as in the PyTorch module
    v = h @ w_v + b_v
    return pi, v


if __name__ == "__main__":
    key = jax.random.PRNGKey(0)
    k_x, k_p = jax.random.split(key)

    B = 8  # small batch of CartPole-style 4-dim observations
    x = jax.random.normal(k_x, (B, IN_DIM), dtype=jnp.float32)
    params = init_params(k_p)

    # Built ONCE at init time (hoisted out of the per-call path).
    param_slab = fuse_params(*params)
    jax.block_until_ready(param_slab)

    pi, v = actor_critic_forward(x, param_slab)
    jax.block_until_ready((pi, v))

    pi_ref, v_ref = reference_forward(x, *params)
    assert pi.shape == (B, N_PI) and v.shape == (B, 1)
    assert jnp.allclose(pi, pi_ref, atol=1e-4, rtol=1e-4)
    assert jnp.allclose(v, v_ref, atol=1e-4, rtol=1e-4)
    assert jnp.allclose(jnp.sum(pi, axis=0), 1.0, atol=1e-4)  # softmax over dim=0

    print("KERNEL_OK")
</pallas_src>

<mosaic_0001>
module attributes {stable_mosaic.version = 11 : i64} {
  func.func @actor_critic_kernel(%arg0: memref<8x4xf32, #tpu.memory_space<vmem>>, %arg1: memref<136x128xf32, #tpu.memory_space<vmem>>, %arg2: memref<8x128xf32, #tpu.memory_space<vmem>>) attributes {dimension_semantics = [], scalar_prefetch = 0 : i64, scratch_operands = 0 : i64, tpu.core_type = #tpu.core_type<tc>} {
    %c0 = arith.constant 0 : index
    %c0_0 = arith.constant 0 : index
    %0 = vector.load %arg0[%c0, %c0_0] : memref<8x4xf32, #tpu.memory_space<vmem>>, vector<8x4xf32>
    %c0_1 = arith.constant 0 : index
    %c0_2 = arith.constant 0 : index
    %1 = vector.load %arg1[%c0_1, %c0_2] : memref<136x128xf32, #tpu.memory_space<vmem>>, vector<4x128xf32>
    %c4 = arith.constant 4 : index
    %c0_3 = arith.constant 0 : index
    %2 = vector.load %arg1[%c4, %c0_3] : memref<136x128xf32, #tpu.memory_space<vmem>>, vector<1x128xf32>
    %c5 = arith.constant 5 : index
    %c0_4 = arith.constant 0 : index
    %3 = vector.load %arg1[%c5, %c0_4] : memref<136x128xf32, #tpu.memory_space<vmem>>, vector<1x128xf32>
    %c8 = arith.constant 8 : index
    %c0_5 = arith.constant 0 : index
    %4 = vector.load %arg1[%c8, %c0_5] : memref<136x128xf32, #tpu.memory_space<vmem>>, vector<128x128xf32>
    %cst = arith.constant dense<0.000000e+00> : vector<8x128xf32>
    %5 = tpu.matmul %0, %1, %cst {dimension_numbers = #tpu.dot_dimension_numbers<[1], [0], [0], [1], [0, 0, 1, 1], [], []>} : vector<8x4xf32>, vector<4x128xf32>, vector<8x128xf32> -> vector<8x128xf32>
    %6 = vector.broadcast %2 : vector<1x128xf32> to vector<8x128xf32>
    %7 = arith.addf %5, %6 : vector<8x128xf32>
    %cst_6 = arith.constant 0.000000e+00 : f32
    %8 = vector.broadcast %cst_6 : f32 to vector<8x128xf32>
    %9 = arith.maximumf %7, %8 : vector<8x128xf32>
    %cst_7 = arith.constant dense<0.000000e+00> : vector<8x128xf32>
    %10 = tpu.matmul %9, %4, %cst_7 {dimension_numbers = #tpu.dot_dimension_numbers<[1], [0], [0], [1], [0, 0, 1, 1], [], []>} : vector<8x128xf32>, vector<128x128xf32>, vector<8x128xf32> -> vector<8x128xf32>
    %11 = vector.broadcast %3 : vector<1x128xf32> to vector<8x128xf32>
    %12 = arith.addf %10, %11 : vector<8x128xf32>
    %cst_8 = arith.constant dense<0xFF800000> : vector<128xf32>
    %13 = vector.multi_reduction <maximumf>, %12, %cst_8 [0] : vector<8x128xf32> to vector<128xf32>
    %14 = vector.shape_cast %13 : vector<128xf32> to vector<1x128xf32>
    %15 = vector.broadcast %14 : vector<1x128xf32> to vector<8x128xf32>
    %16 = arith.subf %12, %15 : vector<8x128xf32>
    %17 = math.exp %16 : vector<8x128xf32>
    %cst_9 = arith.constant dense<0.000000e+00> : vector<128xf32>
    %18 = vector.multi_reduction <add>, %17, %cst_9 [0] : vector<8x128xf32> to vector<128xf32>
    %19 = vector.shape_cast %18 : vector<128xf32> to vector<1x128xf32>
    %20 = vector.broadcast %19 : vector<1x128xf32> to vector<8x128xf32>
    %21 = arith.divf %17, %20 : vector<8x128xf32>
    %22 = tpu.iota {dimensions = array<i32: 1>} : vector<8x128xi32>
    %c2_i32 = arith.constant 2 : i32
    %23 = vector.broadcast %c2_i32 : i32 to vector<8x128xi32>
    %24 = arith.cmpi slt, %22, %23 : vector<8x128xi32>
    %25 = arith.select %24, %21, %12 : vector<8x128xi1>, vector<8x128xf32>
    %c0_10 = arith.constant 0 : index
    %c0_11 = arith.constant 0 : index
    %26 = vector.load %arg2[%c0_10, %c0_11] : memref<8x128xf32, #tpu.memory_space<vmem>>, vector<8x128xf32>
    tpu.vector_store %arg2[%c0_10, %c0_11], %25 {strides = array<i32>} : memref<8x128xf32, #tpu.memory_space<vmem>>, vector<8x128xf32>,
    return
  }
}

</mosaic_0001>

<bundles_post_ra>
// kernel: actor_critic_forward.1
= control target key start
LH: loop header
LB: loop body
LE: loop exit
PB: predicated region body
PF: predicated region fallthrough
CT: control target
= control target key end

     0   :  { %7 = vsyncpa [#allocation3], 0  ;;  %s350_s9 = smov [#allocation2]   ;;  %s389_s0 = inlined_call_operand.vmem [shape: f32[8,4], index: 0, kind: input, shape index: {}]   ;;  %s390_s1 = inlined_call_operand.hbm [shape: f32[136,128], index: 1, kind: input, shape index: {}]   ;;  %s391_s2 = inlined_call_operand.vmem [shape: f32[8,128], index: 2, kind: output, shape index: {}]  }
   0x1   :  { %s15_s10 = sshll.u32 %s350_s9, 4  ;;  %s326_s13 = scalar_lea.hbm %s390_s1, 2176  ;;  %s16_s10 = int_to_ptr.vmem [resolvable:$true] %s15_s10 }
   0x2   :  { %p327_p0 = scmp.ne.s32.totalorder %s390_s1, %s326_s13  ;;  %p330_p1 = scmp.lt.u32.totalorder %s326_s13, %s390_s1 }
   0x4   :  { %p332_p2 = pnand %p330_p1, %p327_p0 }
   0x6   :  { %335 = shalt.err (!%p332_p2)
}
   0x7   :  { %s336_s18 = scalar_lea.vmem %s16_s10, 2176  ;;  %p341_p4 = scmp.lt.s32.totalorder %s16_s10, %s16_s10 }
   0x8   :  { %p337_p3 = scmp.ne.s32.totalorder %s16_s10, %s336_s18  ;;  %p342_p5 = scmp.lt.s32.totalorder %s336_s18, %s336_s18 }
   0xa   :  { %p343_p6 = por %p342_p5, %p341_p4 }
   0xc   :  { %p344_p7 = pnand %p343_p6, %p337_p3 }
   0xe   :  { %347 = shalt.err (!%p344_p7)
}
   0xf   :  { %s351_s19 = smov 128   ;;  %s352_s20 = smov 8  }
  0x10   :  { %21 = dma.hbm_to_vmem [thread:$0]  %s390_s1, 2176, %s16_s10, [#allocation3], %s351_s19, %s351_s19, %s352_s20  }
  0x11   :  { %348 = dma.done.wait [#allocation3], 2176  }
  0x12   :  { %349 = vsyncadd [#allocation3], 4294965120  ;;  %v353_v0 = vmov 0.0   ;;  %vm354_vm0 = vmmov 0   ;;  %v355_v1 = vmov 0.0|0.0   ;;  %vm53_vm1 = vcmask 1043456  }
  0x13   :  { %252 = vmatprep.subr.mxu0 %v353_v0  ;;  %254 = vmatprep.mubr.msk.f32.mxu0 %vm354_vm0, %v353_v0  ;;  %vm49_vm2 = vcmask 31744   ;;  %v26_v2 = vld [vmem:[#allocation2] sm:$0xf]  ;;  %v29_v4 = vld [vmem:[#allocation2 + $0x8] sm:$0xff]  ;;  %v30_v5 = vld [vmem:[#allocation2 + $0x10] sm:$0xff]  ;;  %v219_v52 = vlaneseq }
  0x14   :  { %292 = vmatprep.subr.bf16.mxu1 %v355_v1  ;;  %289 = vmatprep.mubr.msk.f32.mxu1 %vm354_vm0, %v353_v0  ;;  %v25_v3 = vld [vmem:[%s389_s0] sm:$0xff]  ;;  %v31_v6 = vld [vmem:[#allocation2 + $0x18] sm:$0xff]  ;;  %v293_v8 = vpack.c.bf16 %v30_v5, %v29_v4  ;;  %v33_v10 = vld [vmem:[#allocation2 + $0x28] sm:$0xff] }
  0x15   :  { %253 = vmatpush3.msk.msra.mxu0 %vm53_vm1, %v26_v2  ;;  %v32_v7 = vld [vmem:[#allocation2 + $0x20] sm:$0xff]  ;;  %v34_v11 = vld [vmem:[#allocation2 + $0x30] sm:$0xff]  ;;  %v35_v13 = vld [vmem:[#allocation2 + $0x38] sm:$0xff]  ;;  %v220_v53 = vand.u32 127, %v219_v52 }
  0x16   :  { %255 = vmatmul.mubr.msk.f32.vlgmr.msra.gmra.mrb[0].mxu0 %vm49_vm2, %v25_v3  ;;  %294 = vmatpush3.bf16.msra.mxu1 %v293_v8  ;;  %v296_v9 = vpack.c.bf16 %v32_v7, %v31_v6  ;;  %v299_v12 = vpack.c.bf16 %v34_v11, %v33_v10  ;;  %v36_v14 = vld [vmem:[#allocation2 + $0x40] sm:$0xff]  ;;  %v37_v16 = vld [vmem:[#allocation2 + $0x48] sm:$0xff]  ;;  %v38_v17 = vld [vmem:[#allocation2 + $0x50] sm:$0xff] }
  0x17   :  { %295 = vmatprep.subr.bf16.mxu1 %v355_v1  ;;  %v302_v15 = vpack.c.bf16 %v36_v14, %v35_v13  ;;  %v305_v18 = vpack.c.bf16 %v38_v17, %v37_v16  ;;  %v39_v19 = vld [vmem:[#allocation2 + $0x58] sm:$0xff]  ;;  %v40_v20 = vld [vmem:[#allocation2 + $0x60] sm:$0xff]  ;;  %v41_v22 = vld [vmem:[#allocation2 + $0x68] sm:$0xff]  ;;  %vm221_vm3 = vcmp.lt.s32.totalorder %v220_v53, 2 }
  0x18   :  { %v308_v21 = vpack.c.bf16 %v40_v20, %v39_v19  ;;  %v42_v23 = vld [vmem:[#allocation2 + $0x70] sm:$0xff]  ;;  %v43_v25 = vld [vmem:[#allocation2 + $0x78] sm:$0xff]  ;;  %v44_v26 = vld [vmem:[#allocation2 + $0x80] sm:$0xff] }
  0x19   :  { %v311_v24 = vpack.c.bf16 %v42_v23, %v41_v22  ;;  %v314_v27 = vpack.c.bf16 %v44_v26, %v43_v25  ;;  %v229_v28 = vld [vmem:[#allocation2 + $0x4] ss:$0 sm:$0xff]  ;;  %v232_v33 = vld [vmem:[#allocation2 + $0x5] ss:$0 sm:$0xff] }
  0x1a   :  { %297 = vmatpush3.bf16.msra.mxu1 %v296_v9 }
  0x1b   :  { %298 = vmatprep.subr.bf16.mxu1 %v355_v1 }
  0x1e   :  { %300 = vmatpush3.bf16.msra.mxu1 %v299_v12 }
  0x1f   :  { %301 = vmatprep.subr.bf16.mxu1 %v355_v1 }
  0x22   :  { %303 = vmatpush3.bf16.msra.mxu1 %v302_v15 }
  0x23   :  { %304 = vmatprep.subr.bf16.mxu1 %v355_v1 }
  0x26   :  { %306 = vmatpush3.bf16.msra.mxu1 %v305_v18 }
  0x27   :  { %307 = vmatprep.subr.bf16.mxu1 %v355_v1 }
  0x2a   :  { %309 = vmatpush3.bf16.msra.mxu1 %v308_v21 }
  0x2b   :  { %310 = vmatprep.subr.bf16.mxu1 %v355_v1 }
  0x2e   :  { %312 = vmatpush3.bf16.msra.mxu1 %v311_v24 }
  0x2f   :  { %313 = vmatprep.subr.bf16.mxu1 %v355_v1 }
  0x32   :  { %315 = vmatpush3.bf16.msra.mxu1 %v314_v27 }
  0xe9   :  { %v123_v29 = vpop.f32.mrb[0].mxu0 }
  0xea   :  { %v124_v30 = vadd.f32 %v229_v28, %v123_v29  ;;  %v256_v31 = vpop.f32.mrb[1].mxu0 }
  0xec   :  { %v127_v32 = vmax.f32 %v124_v30, 0.0 }
  0xee   :  { %290 = vmatmul.mubr.f32.vlgmr.msra.gmra.mrb[0].mxu1 %v127_v32 }
 0x1c1   :  { %v198_v34 = vpop.f32.mrb[0].mxu1 }
 0x1c2   :  { %v199_v35 = vadd.f32 %v232_v33, %v198_v34  ;;  %v291_v36 = vpop.f32.mrb[1].mxu1 }
 0x1c4   :  { %v202_v37 = vrot.slane %v199_v35, 4 }
 0x1c6   :  { %v203_v38 = vmax.f32 %v199_v35, %v202_v37 }
 0x1c8   :  { %v204_v39 = vrot.slane %v203_v38, 2 }
 0x1ca   :  { %v205_v40 = vmax.f32 %v203_v38, %v204_v39 }
 0x1cc   :  { %v206_v41 = vrot.slane %v205_v40, 1 }
 0x1ce   :  { %v207_v42 = vmax.f32 %v205_v40, %v206_v41 }
 0x1d0   :  { %v208_v43 = vsub.f32 %v199_v35, %v207_v42 }
 0x1d2   :  { %v209_v44 = vmul.f32 1.442695, %v208_v43 }
 0x1d4   :  { %322 = vpow2.f32 %v209_v44 }
 0x1de   :  { %v323_v45 = vpop.eup %322 }
 0x1df   :  { %v211_v46 = vrot.slane %v323_v45, 4 }
 0x1e1   :  { %v212_v47 = vadd.f32 %v323_v45, %v211_v46 }
 0x1e3   :  { %v213_v48 = vrot.slane %v212_v47, 2 }
 0x1e5   :  { %v214_v49 = vadd.f32 %v213_v48, %v212_v47 }
 0x1e7   :  { %v215_v50 = vrot.slane %v214_v49, 1 }
 0x1e9   :  { %v216_v51 = vadd.f32 %v215_v50, %v214_v49 }
 0x1eb   :  { %324 = vrcp.f32 %v216_v51 }
 0x1f5   :  { %v325_v54 = vpop.eup %324 }
 0x1f6   :  { %v218_v55 = vmul.f32 %v325_v54, %v323_v45 }
 0x1f8   :  { %v222_v56 = vsel %vm221_vm3, %v218_v55, %v199_v35 }
 0x1f9   :  { %223 = vst [vmem:[%s391_s2] sm:$0xff] %v222_v56 }
 0x1fa   :  { %228 = vsyncpa [#allocation3], 1 }

</bundles_post_ra>
